<compile_context>
chip_gen: v7x
topology: tpu7x:2x2x1
jax: 0.10.0
libtpu: 0.0.40
codegen_flags: <defaults>
</compile_context>

<pallas_src>
import jax
import jax.numpy as jnp
import numpy as np
from jax.experimental import pallas as pl
from jax.experimental.pallas import tpu as pltpu

BN_EPS = 1e-5
NUM_LAYERS = 6  # conv1, conv2, conv3, fc1, fc2, fc3


# ----------------------------------------------------------------------------
# Kernel: one grid step = TB batch elements, all layers fused.
# ----------------------------------------------------------------------------
def _stn_kernel(x_ref, w_ref, b_ref, o_ref):
    # x_ref: (TB, N, K)    raw point-major input tile (K = k, unpadded)
    # w_ref: (6*C, C)      per-layer (C, C) zero-padded, BN-folded weights
    # b_ref: (8, C)        per-layer BN-folded biases (row i = layer i)
    # o_ref: (1, TB, C)    output rows for this grid step (first k*k lanes real)
    TB, N, K = x_ref.shape
    C = w_ref.shape[-1]

    def layer(v, idx, act=True):
        w = w_ref[idx * C:(idx + 1) * C, :]              # static aligned slice
        y = jnp.dot(v, w, preferred_element_type=jnp.float32)
        y = y + b_ref[idx:idx + 1, :]
        return jnp.maximum(y, 0.0) if act else y

    x = x_ref[...].reshape(TB * N, K)                    # view merge (N % 8 == 0)

    # layer 0 (conv1): contract the tiny K channel dim on the VPU
    h = x[:, 0:1] * w_ref[0:1, :]                        # (TB*N,1)*(1,C)->(TB*N,C)
    for j in range(1, K):
        h = h + x[:, j:j + 1] * w_ref[j:j + 1, :]
    h = jnp.maximum(h + b_ref[0:1, :], 0.0)              # (TB*N, C)

    # shared MLP (1x1 convs) layers 2-3 on all points of all TB elements
    h = layer(h, 1)
    h = layer(h, 2)                                      # (TB*N, C)

    # per-element global max-pool over points
    g = jnp.max(h.reshape(TB, N, C), axis=1)             # (TB, C)

    # FC head (fc3 bias already contains the flattened identity)
    g = layer(g, 3)
    g = layer(g, 4)
    o_ref[0, :, :] = layer(g, 5, act=False).astype(o_ref.dtype)


# ----------------------------------------------------------------------------
# Wrapper
# ----------------------------------------------------------------------------
def _pick_tb(B, N, tb):
    # VMEM budget: the (TB, N, k) input block lane-pads k -> 128 in VMEM and is
    # double buffered; the f32 activation slab (TB*N, C) lives alongside.
    per_elem = N * 128 * 4 * 4
    budget = 12 * 1024 * 1024            # comfortably under v5e's 16 MiB default
    tb = min(tb, max(1, budget // per_elem))
    tb = min(tb, B)
    if B >= 2:
        tb = min(tb, (B + 1) // 2)       # keep >= 2 grid steps (v7x megacore)
    return max(tb, 1)


def stnkd_forward(x, w_slab, b_slab, *, k, hidden_dim, tb=128):
    """x: (B, k, n_pts) float32 (PyTorch Conv1d layout). Returns (B, k, k)."""
    B, kk, N = x.shape
    C = hidden_dim
    assert kk == k
    assert N % 8 == 0, "n_pts must be a multiple of 8"

    # Single cheap layout pass (no channel padding): points on sublanes,
    # channels (k lanes) last.
    xp = jnp.transpose(x, (0, 2, 1))                     # (B, N, k)

    TB = _pick_tb(B, N, tb)
    G = (B + TB - 1) // TB
    Bp = G * TB
    if Bp != B:
        xp = jnp.pad(xp, ((0, Bp - B), (0, 0), (0, 0)))  # junk rows, sliced off

    out = pl.pallas_call(
        _stn_kernel,
        grid=(G,),
        in_specs=[
            pl.BlockSpec((TB, N, k), lambda b: (b, 0, 0)),
            pl.BlockSpec(w_slab.shape, lambda b: (0, 0)),
            pl.BlockSpec(b_slab.shape, lambda b: (0, 0)),
        ],
        out_specs=pl.BlockSpec((1, TB, C), lambda b: (b, 0, 0)),
        out_shape=jax.ShapeDtypeStruct((G, TB, C), jnp.float32),
        compiler_params=pltpu.CompilerParams(
            dimension_semantics=("parallel",),
            vmem_limit_bytes=32 * 1024 * 1024),
    )(xp, w_slab, b_slab)

    return out.reshape(Bp, C)[:B, :k * k].reshape(B, k, k)


# ----------------------------------------------------------------------------
# Parameter init (shapes from the module __init__) and BN-folded packing
# ----------------------------------------------------------------------------
def init_params(key, k=3, hidden_dim=64):
    h = hidden_dim
    dims = [(k, h // 4), (h // 4, h // 2), (h // 2, h),   # conv1..3 (+bn1..3)
            (h, h), (h, h // 2),                          # fc1, fc2 (+bn4, bn5)
            (h // 2, k * k)]                              # fc3 (no bn)
    keys = jax.random.split(key, 2 * len(dims))
    params = []
    for i, (cin, cout) in enumerate(dims):
        bound = 1.0 / np.sqrt(cin)
        w = jax.random.uniform(keys[2 * i], (cin, cout), jnp.float32, -bound, bound)
        b = jax.random.uniform(keys[2 * i + 1], (cout,), jnp.float32, -bound, bound)
        bn = None
        if i < 5:  # default-initialized BatchNorm1d
            bn = {"gamma": jnp.ones((cout,), jnp.float32),
                  "beta": jnp.zeros((cout,), jnp.float32),
                  "mean": jnp.zeros((cout,), jnp.float32),
                  "var": jnp.ones((cout,), jnp.float32)}
        params.append({"w": w, "b": b, "bn": bn})
    return params


def pack_params(params, k=3, hidden_dim=64):
    """Fold eval-mode BN + identity into weights/biases and pack into 2 slabs."""
    C = hidden_dim
    w_slab = np.zeros((NUM_LAYERS * C, C), np.float32)
    b_slab = np.zeros((8, C), np.float32)
    for i, p in enumerate(params):
        w = np.asarray(p["w"], np.float32)
        b = np.asarray(p["b"], np.float32)
        if p["bn"] is not None:
            s = np.asarray(p["bn"]["gamma"]) / np.sqrt(np.asarray(p["bn"]["var"]) + BN_EPS)
            t = np.asarray(p["bn"]["beta"]) - np.asarray(p["bn"]["mean"]) * s
            w = w * s[None, :]
            b = b * s + t
        if i == NUM_LAYERS - 1:                            # x = fc3(x) + I.flatten()
            b = b + np.eye(k, dtype=np.float32).reshape(-1)
        cin, cout = w.shape
        w_slab[i * C:i * C + cin, :cout] = w
        b_slab[i, :cout] = b
    return jnp.asarray(w_slab), jnp.asarray(b_slab)


# ----------------------------------------------------------------------------
# Pure-JAX reference (mirrors the torch forward, eval-mode BN) for checking
# ----------------------------------------------------------------------------
def reference_forward(x, params, k=3, eps=BN_EPS):
    hp = jax.lax.Precision.HIGHEST
    B = x.shape[0]

    def bn(v, p):
        return (v - p["mean"]) / jnp.sqrt(p["var"] + eps) * p["gamma"] + p["beta"]

    v = jnp.transpose(x, (0, 2, 1))                       # (B, N, k)
    for i in range(3):
        p = params[i]
        v = jnp.maximum(bn(jnp.dot(v, p["w"], precision=hp) + p["b"], p["bn"]), 0.0)
    g = jnp.max(v, axis=1)                                # (B, hidden)
    for i in range(3, 5):
        p = params[i]
        g = jnp.maximum(bn(jnp.dot(g, p["w"], precision=hp) + p["b"], p["bn"]), 0.0)
    p = params[5]
    out = jnp.dot(g, p["w"], precision=hp) + p["b"]
    out = out + jnp.eye(k, dtype=jnp.float32).reshape(1, -1)
    return out.reshape(B, k, k)


if __name__ == "__main__":
    key = jax.random.PRNGKey(0)
    kx, kp = jax.random.split(key)

    B, K, N, H = 4, 3, 64, 64                             # small shapes
    x = jax.random.normal(kx, (B, K, N), dtype=jnp.float32)
    params = init_params(kp, k=K, hidden_dim=H)
    w_slab, b_slab = pack_params(params, k=K, hidden_dim=H)

    out = stnkd_forward(x, w_slab, b_slab, k=K, hidden_dim=H)
    out = jax.block_until_ready(out)
    assert out.shape == (B, K, K), out.shape

    ref = reference_forward(x, params, k=K)
    err = float(jnp.max(jnp.abs(out - ref)))
    assert err < 1e-4, f"max abs error too large: {err}"

    print("KERNEL_OK")
</pallas_src>

<mosaic_0001>
module attributes {stable_mosaic.version = 11 : i64} {
  func.func @_stn_kernel(%arg0: i32, %arg1: memref<2x64x3xf32, #tpu.memory_space<vmem>>, %arg2: memref<384x64xf32, #tpu.memory_space<vmem>>, %arg3: memref<8x64xf32, #tpu.memory_space<vmem>>, %arg4: memref<1x2x64xf32, #tpu.memory_space<vmem>>) attributes {dimension_semantics = [#tpu.dimension_semantics<parallel>], iteration_bounds = array<i64: 2>, scalar_prefetch = 0 : i64, scratch_operands = 0 : i64, tpu.core_type = #tpu.core_type<tc>, window_params = [{transform_indices = @transform_0, window_bounds = array<i64: 2, 64, 3>}, {pipeline_mode = #tpu.pipeline_mode<synchronous>, transform_indices = @transform_1, window_bounds = array<i64: 384, 64>}, {pipeline_mode = #tpu.pipeline_mode<synchronous>, transform_indices = @transform_2, window_bounds = array<i64: 8, 64>}, {transform_indices = @transform_3, window_bounds = array<i64: 1, 2, 64>}]} {
    %c0 = arith.constant 0 : index
    %c0_0 = arith.constant 0 : index
    %c0_1 = arith.constant 0 : index
    %0 = vector.load %arg1[%c0, %c0_0, %c0_1] : memref<2x64x3xf32, #tpu.memory_space<vmem>>, vector<2x64x3xf32>
    %1 = vector.shape_cast %0 : vector<2x64x3xf32> to vector<128x3xf32>
    %2 = vector.extract_strided_slice %1 {offsets = [0, 0], sizes = [128, 1], strides = [1, 1]} : vector<128x3xf32> to vector<128x1xf32>
    %c0_2 = arith.constant 0 : index
    %c0_3 = arith.constant 0 : index
    %3 = vector.load %arg2[%c0_2, %c0_3] : memref<384x64xf32, #tpu.memory_space<vmem>>, vector<1x64xf32>
    %4 = vector.broadcast %2 : vector<128x1xf32> to vector<128x64xf32>
    %5 = vector.broadcast %3 : vector<1x64xf32> to vector<128x64xf32>
    %6 = arith.mulf %4, %5 : vector<128x64xf32>
    %7 = vector.extract_strided_slice %1 {offsets = [0, 1], sizes = [128, 1], strides = [1, 1]} : vector<128x3xf32> to vector<128x1xf32>
    %c1 = arith.constant 1 : index
    %c0_4 = arith.constant 0 : index
    %8 = vector.load %arg2[%c1, %c0_4] : memref<384x64xf32, #tpu.memory_space<vmem>>, vector<1x64xf32>
    %9 = vector.broadcast %7 : vector<128x1xf32> to vector<128x64xf32>
    %10 = vector.broadcast %8 : vector<1x64xf32> to vector<128x64xf32>
    %11 = arith.mulf %9, %10 : vector<128x64xf32>
    %12 = arith.addf %6, %11 : vector<128x64xf32>
    %13 = vector.extract_strided_slice %1 {offsets = [0, 2], sizes = [128, 1], strides = [1, 1]} : vector<128x3xf32> to vector<128x1xf32>
    %c2 = arith.constant 2 : index
    %c0_5 = arith.constant 0 : index
    %14 = vector.load %arg2[%c2, %c0_5] : memref<384x64xf32, #tpu.memory_space<vmem>>, vector<1x64xf32>
    %15 = vector.broadcast %13 : vector<128x1xf32> to vector<128x64xf32>
    %16 = vector.broadcast %14 : vector<1x64xf32> to vector<128x64xf32>
    %17 = arith.mulf %15, %16 : vector<128x64xf32>
    %18 = arith.addf %12, %17 : vector<128x64xf32>
    %c0_6 = arith.constant 0 : index
    %c0_7 = arith.constant 0 : index
    %19 = vector.load %arg3[%c0_6, %c0_7] : memref<8x64xf32, #tpu.memory_space<vmem>>, vector<1x64xf32>
    %20 = vector.broadcast %19 : vector<1x64xf32> to vector<128x64xf32>
    %21 = arith.addf %18, %20 : vector<128x64xf32>
    %cst = arith.constant 0.000000e+00 : f32
    %22 = vector.broadcast %cst : f32 to vector<128x64xf32>
    %23 = arith.maximumf %21, %22 : vector<128x64xf32>
    %c64 = arith.constant 64 : index
    %c0_8 = arith.constant 0 : index
    %24 = vector.load %arg2[%c64, %c0_8] : memref<384x64xf32, #tpu.memory_space<vmem>>, vector<64x64xf32>
    %cst_9 = arith.constant dense<0.000000e+00> : vector<128x64xf32>
    %25 = tpu.matmul %23, %24, %cst_9 {dimension_numbers = #tpu.dot_dimension_numbers<[1], [0], [0], [1], [0, 0, 1, 1], [], []>} : vector<128x64xf32>, vector<64x64xf32>, vector<128x64xf32> -> vector<128x64xf32>
    %c1_10 = arith.constant 1 : index
    %c0_11 = arith.constant 0 : index
    %26 = vector.load %arg3[%c1_10, %c0_11] : memref<8x64xf32, #tpu.memory_space<vmem>>, vector<1x64xf32>
    %27 = vector.broadcast %26 : vector<1x64xf32> to vector<128x64xf32>
    %28 = arith.addf %25, %27 : vector<128x64xf32>
    %cst_12 = arith.constant 0.000000e+00 : f32
    %29 = vector.broadcast %cst_12 : f32 to vector<128x64xf32>
    %30 = arith.maximumf %28, %29 : vector<128x64xf32>
    %c128 = arith.constant 128 : index
    %c0_13 = arith.constant 0 : index
    %31 = vector.load %arg2[%c128, %c0_13] : memref<384x64xf32, #tpu.memory_space<vmem>>, vector<64x64xf32>
    %cst_14 = arith.constant dense<0.000000e+00> : vector<128x64xf32>
    %32 = tpu.matmul %30, %31, %cst_14 {dimension_numbers = #tpu.dot_dimension_numbers<[1], [0], [0], [1], [0, 0, 1, 1], [], []>} : vector<128x64xf32>, vector<64x64xf32>, vector<128x64xf32> -> vector<128x64xf32>
    %c2_15 = arith.constant 2 : index
    %c0_16 = arith.constant 0 : index
    %33 = vector.load %arg3[%c2_15, %c0_16] : memref<8x64xf32, #tpu.memory_space<vmem>>, vector<1x64xf32>
    %34 = vector.broadcast %33 : vector<1x64xf32> to vector<128x64xf32>
    %35 = arith.addf %32, %34 : vector<128x64xf32>
    %cst_17 = arith.constant 0.000000e+00 : f32
    %36 = vector.broadcast %cst_17 : f32 to vector<128x64xf32>
    %37 = arith.maximumf %35, %36 : vector<128x64xf32>
    %38 = vector.shape_cast %37 : vector<128x64xf32> to vector<2x64x64xf32>
    %cst_18 = arith.constant dense<0xFF800000> : vector<2x64xf32>
    %39 = vector.multi_reduction <maximumf>, %38, %cst_18 [1] : vector<2x64x64xf32> to vector<2x64xf32>
    %c192 = arith.constant 192 : index
    %c0_19 = arith.constant 0 : index
    %40 = vector.load %arg2[%c192, %c0_19] : memref<384x64xf32, #tpu.memory_space<vmem>>, vector<64x64xf32>
    %cst_20 = arith.constant dense<0.000000e+00> : vector<2x64xf32>
    %41 = tpu.matmul %39, %40, %cst_20 {dimension_numbers = #tpu.dot_dimension_numbers<[1], [0], [0], [1], [0, 0, 1, 1], [], []>} : vector<2x64xf32>, vector<64x64xf32>, vector<2x64xf32> -> vector<2x64xf32>
    %c3 = arith.constant 3 : index
    %c0_21 = arith.constant 0 : index
    %42 = vector.load %arg3[%c3, %c0_21] : memref<8x64xf32, #tpu.memory_space<vmem>>, vector<1x64xf32>
    %43 = vector.broadcast %42 : vector<1x64xf32> to vector<2x64xf32>
    %44 = arith.addf %41, %43 : vector<2x64xf32>
    %cst_22 = arith.constant 0.000000e+00 : f32
    %45 = vector.broadcast %cst_22 : f32 to vector<2x64xf32>
    %46 = arith.maximumf %44, %45 : vector<2x64xf32>
    %c256 = arith.constant 256 : index
    %c0_23 = arith.constant 0 : index
    %47 = vector.load %arg2[%c256, %c0_23] : memref<384x64xf32, #tpu.memory_space<vmem>>, vector<64x64xf32>
    %cst_24 = arith.constant dense<0.000000e+00> : vector<2x64xf32>
    %48 = tpu.matmul %46, %47, %cst_24 {dimension_numbers = #tpu.dot_dimension_numbers<[1], [0], [0], [1], [0, 0, 1, 1], [], []>} : vector<2x64xf32>, vector<64x64xf32>, vector<2x64xf32> -> vector<2x64xf32>
    %c4 = arith.constant 4 : index
    %c0_25 = arith.constant 0 : index
    %49 = vector.load %arg3[%c4, %c0_25] : memref<8x64xf32, #tpu.memory_space<vmem>>, vector<1x64xf32>
    %50 = vector.broadcast %49 : vector<1x64xf32> to vector<2x64xf32>
    %51 = arith.addf %48, %50 : vector<2x64xf32>
    %cst_26 = arith.constant 0.000000e+00 : f32
    %52 = vector.broadcast %cst_26 : f32 to vector<2x64xf32>
    %53 = arith.maximumf %51, %52 : vector<2x64xf32>
    %c320 = arith.constant 320 : index
    %c0_27 = arith.constant 0 : index
    %54 = vector.load %arg2[%c320, %c0_27] : memref<384x64xf32, #tpu.memory_space<vmem>>, vector<64x64xf32>
    %cst_28 = arith.constant dense<0.000000e+00> : vector<2x64xf32>
    %55 = tpu.matmul %53, %54, %cst_28 {dimension_numbers = #tpu.dot_dimension_numbers<[1], [0], [0], [1], [0, 0, 1, 1], [], []>} : vector<2x64xf32>, vector<64x64xf32>, vector<2x64xf32> -> vector<2x64xf32>
    %c5 = arith.constant 5 : index
    %c0_29 = arith.constant 0 : index
    %56 = vector.load %arg3[%c5, %c0_29] : memref<8x64xf32, #tpu.memory_space<vmem>>, vector<1x64xf32>
    %57 = vector.broadcast %56 : vector<1x64xf32> to vector<2x64xf32>
    %58 = arith.addf %55, %57 : vector<2x64xf32>
    %c0_30 = arith.constant 0 : index
    %c0_31 = arith.constant 0 : index
    %c0_32 = arith.constant 0 : index
    %59 = vector.load %arg4[%c0_30, %c0_31, %c0_32] : memref<1x2x64xf32, #tpu.memory_space<vmem>>, vector<1x2x64xf32>
    %60 = vector.shape_cast %59 : vector<1x2x64xf32> to vector<2x64xf32>
    %61 = vector.shape_cast %58 : vector<2x64xf32> to vector<1x2x64xf32>
    tpu.vector_store %arg4[%c0_30, %c0_31, %c0_32], %61 {strides = array<i32>} : memref<1x2x64xf32, #tpu.memory_space<vmem>>, vector<1x2x64xf32>,
    return
  }
  func.func @transform_0(%arg0: i32) -> (i32, i32, i32) {
    %c0_i32 = arith.constant 0 : i32
    %c0_i32_0 = arith.constant 0 : i32
    %c0_i32_1 = arith.constant 0 : i32
    return %arg0, %c0_i32, %c0_i32_0 : i32, i32, i32
  }
  func.func @transform_1(%arg0: i32) -> (i32, i32) {
    %c0_i32 = arith.constant 0 : i32
    %c0_i32_0 = arith.constant 0 : i32
    %c0_i32_1 = arith.constant 0 : i32
    return %c0_i32, %c0_i32_0 : i32, i32
  }
  func.func @transform_2(%arg0: i32) -> (i32, i32) {
    %c0_i32 = arith.constant 0 : i32
    %c0_i32_0 = arith.constant 0 : i32
    %c0_i32_1 = arith.constant 0 : i32
    return %c0_i32, %c0_i32_0 : i32, i32
  }
  func.func @transform_3(%arg0: i32) -> (i32, i32, i32) {
    %c0_i32 = arith.constant 0 : i32
    %c0_i32_0 = arith.constant 0 : i32
    %c0_i32_1 = arith.constant 0 : i32
    return %arg0, %c0_i32, %c0_i32_0 : i32, i32, i32
  }
}

</mosaic_0001>

<bundles_post_ra>
// kernel: tpu_custom_call.1
= control target key start
LH: loop header
LB: loop body
LE: loop exit
PB: predicated region body
PF: predicated region fallthrough
CT: control target
= control target key end

     0   :  { %8 = vsyncpa [#allocation3], 0  ;;  %s2337_s0 = inlined_call_operand.vmem [shape: f32[4,64,3], index: 0, kind: input, shape index: {}]   ;;  %s2338_s1 = inlined_call_operand.vmem [shape: f32[384,64], index: 1, kind: input, shape index: {}]   ;;  %s2339_s2 = inlined_call_operand.vmem [shape: f32[8,64], index: 2, kind: input, shape index: {}]   ;;  %s2340_s3 = inlined_call_operand.hbm [shape: f32[2,2,64], index: 3, kind: output, shape index: {}]  }
   0x1   :  { %10 = vsyncpa [#allocation3 + $0x1], 0  ;;  %s1856_s12 = smov 0   ;;  %s1858_s13 = smov 0  }
   0x2   :  { %s1860_s14 = smov 0   ;;  %s1862_s15 = smov 0  }
   0x3 LB: > { %s1877_s16 = sadd.s32 4294967295, %s1827_s15   ;;  %s1355_s17 = sadd.s32 4294967294, %s1827_s15   ;;  %s1827_s15 = sphi %s1862_s15, %s2346_s15   ;;  %s1823_s14 = sphi %s1860_s14, %s2345_s14   ;;  %s1819_s13 = sphi %s1858_s13, %s2344_s13   ;;  %s1815_s12 = sphi %s1856_s12, %s2343_s12  }
   0x4   : > { %s1881_s18 = sadd.s32 1, %s1827_s15   ;;  %s91_s19 = sadd.s32 1, %s1823_s14 }
   0x5   : > { %s88_s20 = ssub.s32 %s1827_s15, %s1881_s18  ;;  %p101_p0 = scmp.ne.s32.totalorder %s1823_s14, %s1819_s13 }
   0x6   : > { %p89_p1 = scmp.eq.s32.totalorder %s88_s20, 0  ;;  %p102_p2 = scmp.eq.s32.totalorder %s1877_s16, 1 }
   0x7   : > { %p107_p3 = scmp.ne.s32.totalorder %s1819_s13, %s1815_s12  ;;  %p108_p4 = scmp.eq.s32.totalorder %s1355_s17, 1 }
   0x8   : > { %s1892_s21 = scalar_select %p89_p1, %s1823_s14, %s91_s19  }
   0x9   : > { %p1894_p5 = por %p102_p2, %p101_p0  ;;  %p1898_p6 = por %p108_p4, %p107_p3 }
   0xa   : > { %p1358_p7 = scmp.ge.s32.totalorder %s1827_s15, 1  ;;  %p142_p8 = scmp.lt.s32.totalorder %s1827_s15, 3 }
   0xc   : > { %p143_p9 = pnand %p1358_p7, %p142_p8 }
   0xd   : > { %s1360_s24 = sshll.u32 (!%p143_p9), %s1877_s16, 1  ;;  %v1829_v0 = vmov (!%p143_p9), 0   ;;  %v1830_v3 = vmov (!%p143_p9), 1   ;;  %v1831_v5 = vmov (!%p143_p9), 2   ;;  %v530_v12 = vld [vmem:[%s2338_s1 + $0x40] sm:$0xff] (!%p143_p9)  ;;  %v531_v13 = vld [vmem:[%s2338_s1 + $0x48] sm:$0xff] (!%p143_p9) }
   0xe   : > { %146 = sbr.rel (%p143_p9) target bundleno = 1418 (0x58a), region = 32  ;;  %1739 = vset.pattern.permute.xlu1 (!%p143_p9), %v1829_v0  ;;  %1737 = vset.pattern.permute.xlu0 (!%p143_p9), %v1829_v0  ;;  %p168_p10 = scmp.lt.s32.totalorder (!%p143_p9), %s1360_s24, 3  ;;  %v1624_v14 = vpack.c.bf16 (!%p143_p9), %v531_v13, %v530_v12  ;;  %v532_v17 = vld [vmem:[%s2338_s1 + $0x50] sm:$0xff] (!%p143_p9)  ;;  %v533_v18 = vld [vmem:[%s2338_s1 + $0x58] sm:$0xff] (!%p143_p9)  ;;  %v534_v20 = vld [vmem:[%s2338_s1 + $0x60] sm:$0xff] (!%p143_p9)  ;;  %vm543_vm0 = vcmask (!%p143_p9), 523264  }
   0xf   : > { %v1628_v19 = vpack.c.bf16 (!%p143_p9), %v533_v18, %v532_v17  ;;  %v535_v21 = vld [vmem:[%s2338_s1 + $0x68] sm:$0xff] (!%p143_p9)  ;;  %v536_v23 = vld [vmem:[%s2338_s1 + $0x70] sm:$0xff] (!%p143_p9)  ;;  %v537_v24 = vld [vmem:[%s2338_s1 + $0x78] sm:$0xff] (!%p143_p9)  ;;  %vm1833_vm1 = vmmov (!%p143_p9), 0   ;;  %vm1032_vm2 = vcmask (!%p143_p9), 1041409   ;;  %s164_s8 = sand.u32 (!%p143_p9), 1, %s1819_s13  }
  0x10   : > { %1625 = vmatprep.subr.bf16.mxu0 (!%p143_p9), %v1624_v14  ;;  %v1632_v22 = vpack.c.bf16 (!%p143_p9), %v535_v21, %v534_v20  ;;  %v1636_v25 = vpack.c.bf16 (!%p143_p9), %v537_v24, %v536_v23  ;;  %v1993_v33 = vld [vmem:[%s2338_s1] ss:$0 sm:$0xff] (!%p143_p9)  ;;  %v1999_v35 = vld [vmem:[%s2338_s1 + $0x1] ss:$0 sm:$0xff] (!%p143_p9)  ;;  %v2006_v39 = vld [vmem:[%s2338_s1 + $0x2] ss:$0 sm:$0xff] (!%p143_p9) }
  0x11   : > { %1627 = vmatpush3.bf16.msra.mxu0 (!%p143_p9), %v1624_v14  ;;  %v2013_v44 = vld [vmem:[%s2339_s2] ss:$0 sm:$0xff] (!%p143_p9)  ;;  %v754_v55 = vld [vmem:[%s2338_s1 + $0x88] sm:$0xff] (!%p143_p9)  ;;  %v755_v56 = vld [vmem:[%s2338_s1 + $0x90] sm:$0xff] (!%p143_p9)  ;;  %s1359_s9 = sshll.u32 (!%p143_p9), %s164_s8, 1  ;;  %s1408_s17 = sshll.u32 (!%p143_p9), %s1877_s16, 5 }
  0x12   : > { %1629 = vmatprep.subr.bf16.mxu0 (!%p143_p9), %v1628_v19  ;;  %v753_v54 = vld [vmem:[%s2338_s1 + $0x80] sm:$0xff] (!%p143_p9)  ;;  %v756_v59 = vld [vmem:[%s2338_s1 + $0x98] sm:$0xff] (!%p143_p9)  ;;  %v758_v62 = vld [vmem:[%s2338_s1 + $0xa8] sm:$0xff] (!%p143_p9)  ;;  %s166_s19 = scalar_lea.vmem (!%p143_p9), [#allocation2], %s1359_s9  ;;  %vm1280_vm3 = vcmask (!%p143_p9), 517120   ;;  %s2295_s26 = scalar_lea.hbm (!%p143_p9), %s2340_s3, %s1408_s17 }
  0x13   : > { %v1640_v58 = vpack.c.bf16 (!%p143_p9), %v754_v55, %v753_v54  ;;  %v1644_v60 = vpack.c.bf16 (!%p143_p9), %v756_v59, %v755_v56  ;;  %v757_v61 = vld [vmem:[%s2338_s1 + $0xa0] sm:$0xff] (!%p143_p9)  ;;  %s1296_s20 = sshll.u32 (!%p143_p9), %s166_s19, 4  ;;  %s1283_s27 = scalar_lea.sflag (!%p143_p9), [#allocation3], %s164_s8  ;;  %s2297_s20 = int_to_ptr.vmem [resolvable:$true] %s1296_s20 }
  0x14   : > { %s1765_s29 = scalar_lea.vmem (!%p143_p9), %s2297_s20, 32  ;;  %s1835_s16 = smov (!%p143_p9), [#allocation2]  }
  0x15   : > { %s2348_s24 = smov (!%p168_p10, %s1360_s24), 3  ;;  %1631 = vmatpush3.bf16.msra.mxu0 %v1628_v19  ;;  %1641 = vmatprep.subr.bf16.mxu1 %v1640_v58  ;;  %p1766_p11 = scmp.ne.s32.totalorder %s2297_s20, %s1765_s29 }
  0x16   : > { %s1411_s25 = sshll.u32 %s2348_s24, 6  ;;  %1633 = vmatprep.subr.bf16.mxu0 %v1632_v22  ;;  %1643 = vmatpush3.bf16.msra.mxu1 %v1640_v58  ;;  %s1769_s30 = sshll.u32 %s1835_s16, 4  ;;  %s1770_s30 = int_to_ptr.vmem [resolvable:$false] %s1769_s30 }
  0x17   : > { %s1910_s28 = scalar_lea.vmem %s2337_s0, %s1411_s25  ;;  %1645 = vmatprep.subr.bf16.mxu1 %v1644_v60  ;;  %p1767_p12 = pnand %p1766_p11, %p1894_p5 }
  0x18   : > { %v175_v1 = vld [vmem:[%s1910_s28 + $0x8] sm:$0xff]  ;;  %v174_v2 = vld [vmem:[%s1910_s28] sm:$0xff]  ;;  %v177_v4 = vld [vmem:[%s1910_s28 + $0x18] sm:$0xff]  ;;  %s1771_s4 = scalar_lea.vmem %s1770_s30, 64  ;;  %p1772_p0 = scmp.lt.s32.totalorder %s2297_s20, %s1770_s30 }
  0x19   : > { %198 = vperm.xlu1 %1739, %v175_v1   ;;  %193 = vperm.xlu0 %1737, %v174_v2   ;;  %v179_v6 = vld [vmem:[%s1910_s28 + $0x28] sm:$0xff]  ;;  %v176_v7 = vld [vmem:[%s1910_s28 + $0x10] sm:$0xff]  ;;  %v181_v8 = vld [vmem:[%s1910_s28 + $0x38] sm:$0xff]  ;;  %p1768_p13 = pneg %p1767_p12  ;;  %p1773_p1 = scmp.lt.s32.totalorder %s1771_s4, %s1765_s29 }
  0x1a   : > { %v183_v9 = vld [vmem:[%s1910_s28 + $0x48] sm:$0xff]  ;;  %v1926_v10 = vld [vmem:[%s1910_s28 + $0x58] sm:$0xff]  ;;  %v178_v15 = vld [vmem:[%s1910_s28 + $0x20] sm:$0xff]  ;;  %1635 = vmatpush3.bf16.msra.mxu0 %v1632_v22  ;;  %1647 = vmatpush3.bf16.msra.mxu1 %v1644_v60 }
  0x1b   : > { %v1930_v11 = vld [vmem:[%s1910_s28 + $0x68] sm:$0xff]  ;;  %v1942_v16 = vld [vmem:[%s1910_s28 + $0x78] sm:$0xff]  ;;  %1637 = vmatprep.subr.bf16.mxu0 %v1636_v25  ;;  %v180_v26 = vld [vmem:[%s1910_s28 + $0x30] sm:$0xff]  ;;  %p1774_p2 = por %p1773_p1, %p1772_p0 }
  0x1c   : > { %v182_v27 = vld [vmem:[%s1910_s28 + $0x40] sm:$0xff]  ;;  %v184_v28 = vld [vmem:[%s1910_s28 + $0x50] sm:$0xff] }
  0x1d   : > { %1740 = vset.pattern.permute.xlu1 %v1830_v3  ;;  %1738 = vset.pattern.permute.xlu0 %v1830_v3  ;;  %v186_v29 = vld [vmem:[%s1910_s28 + $0x60] sm:$0xff]  ;;  %v188_v30 = vld [vmem:[%s1910_s28 + $0x70] sm:$0xff]  ;;  %p1775_p3 = pnand %p1774_p2, %p1768_p13 }
  0x1e   : > { %297 = vperm.xlu1 %1740, %v175_v1   ;;  %293 = vperm.xlu0 %1738, %v174_v2  }
  0x1f   : > { %1639 = vmatpush3.bf16.msra.mxu0 %v1636_v25 }
  0x22   : > { %1741 = vset.pattern.permute.xlu1 %v1831_v5  ;;  %1744 = vset.pattern.permute.xlu0 %v1829_v0 }
  0x23   : > { %394 = vperm.xlu1 %1741, %v174_v2   ;;  %208 = vperm.xlu0 %1744, %v177_v4  }
  0x27   : > { %1742 = vset.pattern.permute.xlu1 %v1829_v0  ;;  %218 = vperm.xlu0 %1744, %v179_v6  }
  0x28   : > { %203 = vperm.xlu1 %1742, %v176_v7  }
  0x2b   : > { %228 = vperm.xlu0 %1744, %v181_v8  }
  0x2c   : > { %1743 = vset.pattern.permute.xlu1 %v1830_v3 }
  0x2d   : > { %301 = vperm.xlu1 %1743, %v176_v7  }
  0x2f   : > { %238 = vperm.xlu0 %1744, %v183_v9  }
  0x31   : > { %305 = vperm.xlu1 %1743, %v177_v4  }
  0x33   : > { %248 = vperm.xlu0 %1744, %v1926_v10  }
  0x35   : > { %1745 = vset.pattern.permute.xlu1 %v1831_v5 }
  0x36   : > { %402 = vperm.xlu1 %1745, %v176_v7  }
  0x37   : > { %258 = vperm.xlu0 %1744, %v1930_v11  }
  0x3a   : > { %1746 = vset.pattern.permute.xlu1 %v1829_v0 }
  0x3b   : > { %213 = vperm.xlu1 %1746, %v178_v15   ;;  %268 = vperm.xlu0 %1744, %v1942_v16  }
  0x3f   : > { %1747 = vset.pattern.permute.xlu1 %v1830_v3  ;;  %1763 = vset.pattern.permute.xlu0 %v1831_v5 }
  0x40   : > { %309 = vperm.xlu1 %1747, %v178_v15   ;;  %398 = vperm.xlu0 %1763, %v175_v1   ;;  %v1648_v1 = vpack.c.bf16 %v758_v62, %v757_v61 }
  0x42   : > { %1649 = vmatprep.subr.bf16.mxu1 %v1648_v1 }
  0x43   : > { %1651 = vmatpush3.bf16.msra.mxu1 %v1648_v1 }
  0x44   : > { %313 = vperm.xlu1 %1747, %v179_v6   ;;  %406 = vperm.xlu0 %1763, %v177_v4  }
  0x48   : > { %1748 = vset.pattern.permute.xlu1 %v1831_v5  ;;  %414 = vperm.xlu0 %1763, %v179_v6  }
  0x49   : > { %410 = vperm.xlu1 %1748, %v178_v15  }
  0x4c   : > { %422 = vperm.xlu0 %1763, %v181_v8  }
  0x4d   : > { %1749 = vset.pattern.permute.xlu1 %v1829_v0 }
  0x4e   : > { %223 = vperm.xlu1 %1749, %v180_v26  }
  0x50   : > { %430 = vperm.xlu0 %1763, %v183_v9  }
  0x52   : > { %1750 = vset.pattern.permute.xlu1 %v1830_v3 }
  0x53   : > { %317 = vperm.xlu1 %1750, %v180_v26  }
  0x54   : > { %438 = vperm.xlu0 %1763, %v1926_v10  }
  0x57   : > { %321 = vperm.xlu1 %1750, %v181_v8  }
  0x58   : > { %446 = vperm.xlu0 %1763, %v1930_v11  }
  0x5b   : > { %1751 = vset.pattern.permute.xlu1 %v1831_v5 }
  0x5c   : > { %418 = vperm.xlu1 %1751, %v180_v26   ;;  %454 = vperm.xlu0 %1763, %v1942_v16  }
  0x60   : > { %1752 = vset.pattern.permute.xlu1 %v1829_v0 }
  0x61   : > { %233 = vperm.xlu1 %1752, %v182_v27  }
  0x65   : > { %1753 = vset.pattern.permute.xlu1 %v1830_v3 }
  0x66   : > { %325 = vperm.xlu1 %1753, %v182_v27  }
  0x6a   : > { %329 = vperm.xlu1 %1753, %v183_v9  }
  0x6e   : > { %1754 = vset.pattern.permute.xlu1 %v1831_v5 }
  0x6f   : > { %426 = vperm.xlu1 %1754, %v182_v27  }
  0x73   : > { %1755 = vset.pattern.permute.xlu1 %v1829_v0 }
  0x74   : > { %243 = vperm.xlu1 %1755, %v184_v28  }
  0x78   : > { %1756 = vset.pattern.permute.xlu1 %v1830_v3 }
  0x79   : > { %333 = vperm.xlu1 %1756, %v184_v28  }
  0x7d   : > { %337 = vperm.xlu1 %1756, %v1926_v10  }
  0x81   : > { %1757 = vset.pattern.permute.xlu1 %v1831_v5 }
  0x82   : > { %434 = vperm.xlu1 %1757, %v184_v28  }
  0x86   : > { %1758 = vset.pattern.permute.xlu1 %v1829_v0 }
  0x87   : > { %253 = vperm.xlu1 %1758, %v186_v29  }
  0x8b   : > { %1759 = vset.pattern.permute.xlu1 %v1830_v3 }
  0x8c   : > { %341 = vperm.xlu1 %1759, %v186_v29  }
  0x90   : > { %345 = vperm.xlu1 %1759, %v1930_v11  }
  0x94   : > { %1760 = vset.pattern.permute.xlu1 %v1831_v5 }
  0x95   : > { %442 = vperm.xlu1 %1760, %v186_v29  }
  0x98   : > { %v199_v31 = vpop.permute.xlu1 %198  ;;  %v194_v32 = vpop.permute.xlu0 %193 }
  0x99   : > { %1761 = vset.pattern.permute.xlu1 %v1829_v0  ;;  %v275_v34 = vmul.f32 %v1993_v33, %v194_v32  ;;  %v276_v9 = vmul.f32 %v1993_v33, %v199_v31 }
  0x9a   : > { %263 = vperm.xlu1 %1761, %v188_v30  }
  0x9d   : > { %v298_v36 = vpop.permute.xlu1 %297  ;;  %v294_v37 = vpop.permute.xlu0 %293 }
  0x9e   : > { %1762 = vset.pattern.permute.xlu1 %v1830_v3  ;;  %v360_v38 = vmul.f32 %v1999_v35, %v294_v37  ;;  %v361_v7 = vmul.f32 %v1999_v35, %v298_v36 }
  0x9f   : > { %349 = vperm.xlu1 %1762, %v188_v30  }
  0xa0   : > { %v376_v40 = vadd.f32 %v360_v38, %v275_v34  ;;  %v377_v13 = vadd.f32 %v361_v7, %v276_v9 }
  0xa2   : > { %v395_v41 = vpop.permute.xlu1 %394  ;;  %v209_v42 = vpop.permute.xlu0 %208 }
  0xa3   : > { %v461_v43 = vmul.f32 %v2006_v39, %v395_v41  ;;  %353 = vperm.xlu1 %1762, %v1942_v16   ;;  %v278_v14 = vmul.f32 %v1993_v33, %v209_v42 }
  0xa5   : > { %v477_v45 = vadd.f32 %v461_v43, %v376_v40 }
  0xa6   : > { %v219_v46 = vpop.permute.xlu0 %218 }
  0xa7   : > { %1764 = vset.pattern.permute.xlu1 %v1831_v5  ;;  %v204_v47 = vpop.permute.xlu1 %203  ;;  %v498_v48 = vadd.f32 %v2013_v44, %v477_v45  ;;  %v280_v18 = vmul.f32 %v1993_v33, %v219_v46 }
  0xa8   : > { %450 = vperm.xlu1 %1764, %v188_v30   ;;  %v277_v5 = vmul.f32 %v1993_v33, %v204_v47 }
  0xa9   : > { %v514_v49 = vmax.f32 %v498_v48, 0.0 }
  0xaa   : > { %v2017_v50 = vpop.permute.xlu0 %228 }
  0xab   : > { %1503 = vmatprep.mubr.msk.f32.mxu0 %vm543_vm0, %v514_v49  ;;  %v282_v54 = vmul.f32 %v1993_v33, %v2017_v50 }
  0xac   : > { %v302_v51 = vpop.permute.xlu1 %301 }
  0xad   : > { %v362_v2 = vmul.f32 %v1999_v35, %v302_v51 }
  0xae   : > { %v2020_v52 = vpop.permute.xlu0 %238 }
  0xaf   : > { %v378_v8 = vadd.f32 %v362_v2, %v277_v5 }
  0xb0   : > { %v306_v53 = vpop.permute.xlu1 %305 }
  0xb1   : > { %v363_v15 = vmul.f32 %v1999_v35, %v306_v53 }
  0xb2   : > { %v2031_v57 = vpop.permute.xlu0 %248 }
  0xb3   : > { %v379_v22 = vadd.f32 %v363_v15, %v278_v14 }
  0xb5   : > { %v403_v63 = vpop.permute.xlu1 %402 }
  0xb6   : > { %v2042_v0 = vpop.permute.xlu0 %258  ;;  %v463_v6 = vmul.f32 %v2006_v39, %v403_v63 }
  0xb8   : > { %v479_v10 = vadd.f32 %v463_v6, %v378_v8 }
  0xba   : > { %v214_v3 = vpop.permute.xlu1 %213  ;;  %v2045_v4 = vpop.permute.xlu0 %268  ;;  %v500_v19 = vadd.f32 %v2013_v44, %v479_v10 }
  0xbb   : > { %v279_v30 = vmul.f32 %v1993_v33, %v214_v3 }
  0xbc   : > { %v516_v29 = vmax.f32 %v500_v19, 0.0 }
  0xbf   : > { %v310_v11 = vpop.permute.xlu1 %309  ;;  %v399_v12 = vpop.permute.xlu0 %398 }
  0xc0   : > { %v462_v16 = vmul.f32 %v2006_v39, %v399_v12  ;;  %v364_v26 = vmul.f32 %v1999_v35, %v310_v11  ;;  %v284_v11 = vmul.f32 %v1993_v33, %v2020_v52 }
  0xc2   : > { %v478_v17 = vadd.f32 %v462_v16, %v377_v13  ;;  %v380_v38 = vadd.f32 %v364_v26, %v279_v30  ;;  %v286_v30 = vmul.f32 %v1993_v33, %v2031_v57 }
  0xc3   : > { %v314_v20 = vpop.permute.xlu1 %313  ;;  %v407_v21 = vpop.permute.xlu0 %406 }
  0xc4   : > { %v499_v23 = vadd.f32 %v2013_v44, %v478_v17  ;;  %v365_v24 = vmul.f32 %v1999_v35, %v314_v20  ;;  %v464_v25 = vmul.f32 %v2006_v39, %v407_v21 }
  0xc6   : > { %v515_v27 = vmax.f32 %v499_v23, 0.0  ;;  %v480_v28 = vadd.f32 %v464_v25, %v379_v22  ;;  %v381_v32 = vadd.f32 %v365_v24, %v280_v18 }
  0xc7   : > { %v415_v31 = vpop.permute.xlu0 %414 }
  0xc8   : > { %v501_v34 = vadd.f32 %v2013_v44, %v480_v28  ;;  %v466_v36 = vmul.f32 %v2006_v39, %v415_v31  ;;  %v411_v37 = vpop.permute.xlu1 %410  ;;  %1504 = vmatmul.mubr.msk.f32.vlgmr.msra.gmra.mrb[0].mxu0 %vm543_vm0, %v515_v27 }
  0xc9   : > { %v465_v40 = vmul.f32 %v2006_v39, %v411_v37  ;;  %1506 = vmatprep.mubr.msk.f32.mxu0 %vm543_vm0, %v516_v29 }
  0xca   : > { %v517_v41 = vmax.f32 %v501_v34, 0.0  ;;  %v482_v42 = vadd.f32 %v466_v36, %v381_v32 }
  0xcb   : > { %v481_v43 = vadd.f32 %v465_v40, %v380_v38  ;;  %v423_v53 = vpop.permute.xlu0 %422 }
  0xcc   : > { %v503_v45 = vadd.f32 %v2013_v44, %v482_v42  ;;  %1507 = vmatmul.mubr.msk.f32.gmra.mrb[2].mxu0 %vm543_vm0, %v517_v41  ;;  %v468_v58 = vmul.f32 %v2006_v39, %v423_v53  ;;  %v288_v53 = vmul.f32 %v1993_v33, %v2042_v0 }
  0xcd   : > { %v502_v46 = vadd.f32 %v2013_v44, %v481_v43  ;;  %v224_v47 = vpop.permute.xlu1 %223 }
  0xce   : > { %v519_v49 = vmax.f32 %v503_v45, 0.0  ;;  %v281_v61 = vmul.f32 %v1993_v33, %v224_v47 }
  0xcf   : > { %v518_v48 = vmax.f32 %v502_v46, 0.0  ;;  %v431_v10 = vpop.permute.xlu0 %430 }
  0xd0   : > { %v470_v14 = vmul.f32 %v2006_v39, %v431_v10 }
  0xd1   : > { %1509 = vmatprep.mubr.msk.f32.mxu0 %vm543_vm0, %v518_v48 }
  0xd2   : > { %v318_v51 = vpop.permute.xlu1 %317  ;;  %1510 = vmatmul.mubr.msk.f32.gmra.mrb[4].mxu0 %vm543_vm0, %v519_v49 }
  0xd3   : > { %v366_v59 = vmul.f32 %v1999_v35, %v318_v51  ;;  %v439_v28 = vpop.permute.xlu0 %438 }
  0xd4   : > { %v472_v32 = vmul.f32 %v2006_v39, %v439_v28 }
  0xd5   : > { %v382_v1 = vadd.f32 %v366_v59, %v281_v61 }
  0xd6   : > { %v322_v55 = vpop.permute.xlu1 %321 }
  0xd7   : > { %v367_v56 = vmul.f32 %v1999_v35, %v322_v55  ;;  %v447_v55 = vpop.permute.xlu0 %446 }
  0xd9   : > { %v383_v60 = vadd.f32 %v367_v56, %v282_v54 }
  0xdb   : > { %v484_v62 = vadd.f32 %v468_v58, %v383_v60  ;;  %v419_v63 = vpop.permute.xlu1 %418  ;;  %v474_v58 = vmul.f32 %v2006_v39, %v447_v55 }
  0xdc   : > { %v467_v2 = vmul.f32 %v2006_v39, %v419_v63 }
  0xdd   : > { %v505_v5 = vadd.f32 %v2013_v44, %v484_v62 }
  0xde   : > { %v483_v3 = vadd.f32 %v467_v2, %v382_v1 }
  0xdf   : > { %v521_v8 = vmax.f32 %v505_v5, 0.0 }
  0xe0   : > { %v504_v50 = vadd.f32 %v2013_v44, %v483_v3  ;;  %v234_v6 = vpop.permute.xlu1 %233 }
  0xe1   : > { %v283_v17 = vmul.f32 %v1993_v33, %v234_v6  ;;  %v759_v6 = vld [vmem:[%s2338_s1 + $0xb0] sm:$0xff] }
  0xe2   : > { %v520_v7 = vmax.f32 %v504_v50, 0.0 }
  0xe4   : > { %1512 = vmatprep.mubr.msk.f32.mxu0 %vm543_vm0, %v520_v7  ;;  %v760_v7 = vld [vmem:[%s2338_s1 + $0xb8] sm:$0xff] }
  0xe5   : > { %v326_v9 = vpop.permute.xlu1 %325  ;;  %1513 = vmatmul.mubr.msk.f32.gmra.mrb[6].mxu0 %vm543_vm0, %v521_v8 }
  0xe6   : > { %v368_v15 = vmul.f32 %v1999_v35, %v326_v9  ;;  %v1652_v9 = vpack.c.bf16 %v760_v7, %v759_v6 }
  0xe8   : > { %v384_v20 = vadd.f32 %v368_v15, %v283_v17  ;;  %1653 = vmatprep.subr.bf16.mxu1 %v1652_v9 }
  0xe9   : > { %v330_v12 = vpop.permute.xlu1 %329  ;;  %1655 = vmatpush3.bf16.msra.mxu1 %v1652_v9 }
  0xea   : > { %v369_v13 = vmul.f32 %v1999_v35, %v330_v12 }
  0xec   : > { %v385_v16 = vadd.f32 %v369_v13, %v284_v11  ;;  %v455_v11 = vpop.permute.xlu0 %454  ;;  %v290_v13 = vmul.f32 %v1993_v33, %v2045_v4 }
  0xee   : > { %v486_v18 = vadd.f32 %v470_v14, %v385_v16  ;;  %v427_v19 = vpop.permute.xlu1 %426  ;;  %v476_v16 = vmul.f32 %v2006_v39, %v455_v11 }
  0xef   : > { %v469_v21 = vmul.f32 %v2006_v39, %v427_v19 }
  0xf0   : > { %v507_v23 = vadd.f32 %v2013_v44, %v486_v18 }
  0xf1   : > { %v485_v22 = vadd.f32 %v469_v21, %v384_v20 }
  0xf2   : > { %v523_v26 = vmax.f32 %v507_v23, 0.0 }
  0xf3   : > { %v506_v52 = vadd.f32 %v2013_v44, %v485_v22  ;;  %v244_v24 = vpop.permute.xlu1 %243 }
  0xf4   : > { %v285_v37 = vmul.f32 %v1993_v33, %v244_v24 }
  0xf5   : > { %v522_v25 = vmax.f32 %v506_v52, 0.0 }
  0xf7   : > { %1515 = vmatprep.mubr.msk.f32.mxu0 %vm543_vm0, %v522_v25 }
  0xf8   : > { %v334_v27 = vpop.permute.xlu1 %333  ;;  %1516 = vmatmul.mubr.msk.f32.gmra.mrb[8].mxu0 %vm543_vm0, %v523_v26 }
  0xf9   : > { %v370_v34 = vmul.f32 %v1999_v35, %v334_v27 }
  0xfb   : > { %v386_v41 = vadd.f32 %v370_v34, %v285_v37 }
  0xfc   : > { %v338_v29 = vpop.permute.xlu1 %337 }
  0xfd   : > { %v371_v31 = vmul.f32 %v1999_v35, %v338_v29 }
  0xff   : > { %v387_v36 = vadd.f32 %v371_v31, %v286_v30 }
 0x101   : > { %v488_v38 = vadd.f32 %v472_v32, %v387_v36  ;;  %v435_v40 = vpop.permute.xlu1 %434 }
 0x102   : > { %v471_v42 = vmul.f32 %v2006_v39, %v435_v40 }
 0x103   : > { %v509_v45 = vadd.f32 %v2013_v44, %v488_v38 }
 0x104   : > { %v487_v43 = vadd.f32 %v471_v42, %v386_v41 }
 0x105   : > { %v525_v48 = vmax.f32 %v509_v45, 0.0 }
 0x106   : > { %v508_v46 = vadd.f32 %v2013_v44, %v487_v43  ;;  %v254_v57 = vpop.permute.xlu1 %253 }
 0x107   : > { %v287_v60 = vmul.f32 %v1993_v33, %v254_v57 }
 0x108   : > { %v524_v47 = vmax.f32 %v508_v46, 0.0 }
 0x10a   : > { %1518 = vmatprep.mubr.msk.f32.mxu0 %vm543_vm0, %v524_v47 }
 0x10b   : > { %v342_v49 = vpop.permute.xlu1 %341  ;;  %1519 = vmatmul.mubr.msk.f32.gmra.mrb[10].mxu0 %vm543_vm0, %v525_v48 }
 0x10c   : > { %v372_v56 = vmul.f32 %v1999_v35, %v342_v49 }
 0x10e   : > { %v388_v63 = vadd.f32 %v372_v56, %v287_v60 }
 0x10f   : > { %v346_v51 = vpop.permute.xlu1 %345 }
 0x110   : > { %v373_v54 = vmul.f32 %v1999_v35, %v346_v51 }
 0x112   : > { %v389_v59 = vadd.f32 %v373_v54, %v288_v53 }
 0x114   : > { %v490_v61 = vadd.f32 %v474_v58, %v389_v59  ;;  %v443_v62 = vpop.permute.xlu1 %442 }
 0x115   : > { %v473_v1 = vmul.f32 %v2006_v39, %v443_v62 }
 0x116   : > { %v511_v3 = vadd.f32 %v2013_v44, %v490_v61 }
 0x117   : > { %v489_v2 = vadd.f32 %v473_v1, %v388_v63 }
 0x118   : > { %v527_v8 = vmax.f32 %v511_v3, 0.0 }
 0x119   : > { %v510_v0 = vadd.f32 %v2013_v44, %v489_v2  ;;  %v264_v5 = vpop.permute.xlu1 %263 }
 0x11a   : > { %v289_v18 = vmul.f32 %v1993_v33, %v264_v5  ;;  %v1367_v33 = vld [vmem:[%s2339_s2 + $0x1] ss:$0 sm:$0xff] }
 0x11b   : > { %v526_v50 = vmax.f32 %v510_v0, 0.0 }
 0x11d   : > { %1521 = vmatprep.mubr.msk.f32.mxu0 %vm543_vm0, %v526_v50 }
 0x11e   : > { %v350_v10 = vpop.permute.xlu1 %349  ;;  %1522 = vmatmul.mubr.msk.f32.gmra.mrb[12].mxu0 %vm543_vm0, %v527_v8 }
 0x11f   : > { %v374_v15 = vmul.f32 %v1999_v35, %v350_v10 }
 0x121   : > { %v390_v21 = vadd.f32 %v374_v15, %v289_v18  ;;  %v1832_v15 = vmov 0.0|0.0   ;;  %v1020_v18 = vld [vmem:[%s2338_s1 + $0xd8] sm:$0xff] }
 0x122   : > { %v354_v12 = vpop.permute.xlu1 %353  ;;  %1656 = vmatprep.subr.bf16.mxu0 %v1832_v15  ;;  %1668 = vmatprep.subr.bf16.mxu1 %v1832_v15 }
 0x123   : > { %v375_v14 = vmul.f32 %v1999_v35, %v354_v12 }
 0x125   : > { %v391_v17 = vadd.f32 %v375_v14, %v290_v13  ;;  %v1017_v13 = vld [vmem:[%s2338_s1 + $0xc0] sm:$0xff]  ;;  %v1018_v14 = vld [vmem:[%s2338_s1 + $0xc8] sm:$0xff] }
 0x127   : > { %v492_v19 = vadd.f32 %v476_v16, %v391_v17  ;;  %v451_v20 = vpop.permute.xlu1 %450  ;;  %v1657_v16 = vpack.c.bf16 %v1018_v14, %v1017_v13  ;;  %v1019_v17 = vld [vmem:[%s2338_s1 + $0xd0] sm:$0xff] }
 0x128   : > { %v475_v22 = vmul.f32 %v2006_v39, %v451_v20  ;;  %v1021_v20 = vld [vmem:[%s2338_s1 + $0xe0] sm:$0xff] }
 0x129   : > { %v513_v52 = vadd.f32 %v2013_v44, %v492_v19  ;;  %1658 = vmatpush3.bf16.msra.mxu0 %v1657_v16  ;;  %v1660_v19 = vpack.c.bf16 %v1020_v18, %v1019_v17 }
 0x12a   : > { %v491_v23 = vadd.f32 %v475_v22, %v390_v21  ;;  %1659 = vmatprep.subr.bf16.mxu0 %v1832_v15  ;;  %v1022_v21 = vld [vmem:[%s2338_s1 + $0xe8] sm:$0xff] }
 0x12b   : > { %v529_v25 = vmax.f32 %v513_v52, 0.0  ;;  %v1663_v22 = vpack.c.bf16 %v1022_v21, %v1021_v20  ;;  %v1024_v52 = vld [vmem:[%s2338_s1 + $0xf8] sm:$0xff] }
 0x12c   : > { %v512_v24 = vadd.f32 %v2013_v44, %v491_v23  ;;  %v1023_v23 = vld [vmem:[%s2338_s1 + $0xf0] sm:$0xff] }
 0x12d   : > { %1661 = vmatpush3.bf16.msra.mxu0 %v1660_v19 }
 0x12e   : > { %v528_v4 = vmax.f32 %v512_v24, 0.0  ;;  %1662 = vmatprep.subr.bf16.mxu0 %v1832_v15  ;;  %v1666_v24 = vpack.c.bf16 %v1024_v52, %v1023_v23 }
 0x130   : > { %1524 = vmatprep.mubr.msk.f32.mxu0 %vm543_vm0, %v528_v4  ;;  %v2183_v4 = vld [vmem:[%s2339_s2 + $0x2] ss:$0 sm:$0xff] }
 0x131   : > { %1525 = vmatmul.mubr.msk.f32.gmra.mrb[14].mxu0 %vm543_vm0, %v529_v25  ;;  %v1834_v25 = vmov 0.0  }
 0x132   : > { %1664 = vmatpush3.bf16.msra.mxu0 %v1663_v22  ;;  %1583 = vmatprep.mubr.msk.f32.mxu0 %vm1833_vm1, %v1834_v25 }
 0x133   : > { %1665 = vmatprep.subr.bf16.mxu0 %v1832_v15 }
 0x136   : > { %1667 = vmatpush3.bf16.msra.mxu0 %v1666_v24 }
 0x137   : > { %1680 = vmatprep.subr.bf16.mxu0 %v1832_v15 }
 0x19b   : > { %v1505_v35 = vpop.f32.mrb[0].mxu0 }
 0x19c   : > { %v664_v26 = vadd.f32 %v1505_v35, %v1367_v33  ;;  %v658_v27 = vpop.f32.mrb[1].mxu0 }
 0x19d   : > { %v659_v28 = vadd.f32 %v1367_v33, %v658_v27  ;;  %v1107_v27 = vld [vmem:[%s2338_s1 + $0x100] sm:$0xff] }
 0x19e   : > { %v738_v30 = vmax.f32 %v664_v26, 0.0 }
 0x19f   : > { %v737_v39 = vmax.f32 %v659_v28, 0.0  ;;  %v1508_v29 = vpop.f32.mrb[2].mxu0  ;;  %v1108_v28 = vld [vmem:[%s2338_s1 + $0x108] sm:$0xff] }
 0x1a0   : > { %v674_v31 = vadd.f32 %v1508_v29, %v1367_v33  ;;  %v668_v32 = vpop.f32.mrb[3].mxu0 }
 0x1a1   : > { %v669_v44 = vadd.f32 %v1367_v33, %v668_v32  ;;  %1543 = vmatprep.mubr.msk.f32.mxu1 %vm543_vm0, %v737_v39  ;;  %v1109_v39 = vld [vmem:[%s2338_s1 + $0x110] sm:$0xff] }
 0x1a2   : > { %1544 = vmatmul.mubr.msk.f32.vlgmr.msra.gmra.mrb[0].mxu1 %vm543_vm0, %v738_v30  ;;  %v740_v36 = vmax.f32 %v674_v31, 0.0  ;;  %v1669_v30 = vpack.c.bf16 %v1108_v28, %v1107_v27  ;;  %v1110_v31 = vld [vmem:[%s2338_s1 + $0x118] sm:$0xff] }
 0x1a3   : > { %v739_v34 = vmax.f32 %v669_v44, 0.0  ;;  %v1672_v44 = vpack.c.bf16 %v1110_v31, %v1109_v39 }
 0x1a4   : > { %1670 = vmatpush3.bf16.msra.mxu1 %v1669_v30 }
 0x1a5   : > { %v1511_v37 = vpop.f32.mrb[4].mxu0  ;;  %1546 = vmatprep.mubr.msk.f32.mxu1 %vm543_vm0, %v739_v34  ;;  %1671 = vmatprep.subr.bf16.mxu1 %v1832_v15 }
 0x1a6   : > { %v684_v38 = vadd.f32 %v1511_v37, %v1367_v33  ;;  %v678_v40 = vpop.f32.mrb[5].mxu0  ;;  %1547 = vmatmul.mubr.msk.f32.gmra.mrb[2].mxu1 %vm543_vm0, %v740_v36 }
 0x1a7   : > { %v679_v41 = vadd.f32 %v1367_v33, %v678_v40  ;;  %v1112_v40 = vld [vmem:[%s2338_s1 + $0x128] sm:$0xff] }
 0x1a8   : > { %v742_v43 = vmax.f32 %v684_v38, 0.0  ;;  %v1111_v38 = vld [vmem:[%s2338_s1 + $0x120] sm:$0xff]  ;;  %1673 = vmatpush3.bf16.msra.mxu1 %v1672_v44 }
 0x1a9   : > { %v741_v42 = vmax.f32 %v679_v41, 0.0  ;;  %1674 = vmatprep.subr.bf16.mxu1 %v1832_v15 }
 0x1ab   : > { %1549 = vmatprep.mubr.msk.f32.mxu1 %vm543_vm0, %v741_v42 }
 0x1ac   : > { %1550 = vmatmul.mubr.msk.f32.gmra.mrb[4].mxu1 %vm543_vm0, %v742_v43 }
 0x1b8   : > { %v1514_v45 = vpop.f32.mrb[6].mxu0 }
 0x1b9   : > { %v694_v46 = vadd.f32 %v1514_v45, %v1367_v33  ;;  %v688_v57 = vpop.f32.mrb[7].mxu0 }
 0x1ba   : > { %v689_v47 = vadd.f32 %v1367_v33, %v688_v57 }
 0x1bb   : > { %v744_v49 = vmax.f32 %v694_v46, 0.0  ;;  %v1675_v46 = vpack.c.bf16 %v1112_v40, %v1111_v38 }
 0x1bc   : > { %v743_v48 = vmax.f32 %v689_v47, 0.0 }
 0x1bd   : > { %1676 = vmatpush3.bf16.msra.mxu1 %v1675_v46 }
 0x1be   : > { %1552 = vmatprep.mubr.msk.f32.mxu1 %vm543_vm0, %v743_v48  ;;  %v1113_v48 = vld [vmem:[%s2338_s1 + $0x130] sm:$0xff]  ;;  %1677 = vmatprep.subr.bf16.mxu1 %v1832_v15 }
 0x1bf   : > { %1553 = vmatmul.mubr.msk.f32.gmra.mrb[6].mxu1 %vm543_vm0, %v744_v49  ;;  %v1114_v49 = vld [vmem:[%s2338_s1 + $0x138] sm:$0xff] }
 0x1cb   : > { %v1517_v51 = vpop.f32.mrb[8].mxu0 }
 0x1cc   : > { %v704_v53 = vadd.f32 %v1517_v51, %v1367_v33  ;;  %v698_v54 = vpop.f32.mrb[9].mxu0 }
 0x1cd   : > { %v699_v55 = vadd.f32 %v1367_v33, %v698_v54 }
 0x1ce   : > { %v746_v58 = vmax.f32 %v704_v53, 0.0 }
 0x1cf   : > { %v745_v56 = vmax.f32 %v699_v55, 0.0 }
 0x1d1   : > { %1555 = vmatprep.mubr.msk.f32.mxu1 %vm543_vm0, %v745_v56 }
 0x1d2   : > { %1556 = vmatmul.mubr.msk.f32.gmra.mrb[8].mxu1 %vm543_vm0, %v746_v58 }
 0x1de   : > { %v1520_v59 = vpop.f32.mrb[10].mxu0 }
 0x1df   : > { %v714_v60 = vadd.f32 %v1520_v59, %v1367_v33  ;;  %v708_v61 = vpop.f32.mrb[11].mxu0 }
 0x1e0   : > { %v709_v62 = vadd.f32 %v1367_v33, %v708_v61  ;;  %v1678_v61 = vpack.c.bf16 %v1114_v49, %v1113_v48 }
 0x1e1   : > { %v748_v1 = vmax.f32 %v714_v60, 0.0 }
 0x1e2   : > { %v747_v63 = vmax.f32 %v709_v62, 0.0  ;;  %1679 = vmatpush3.bf16.msra.mxu1 %v1678_v61 }
 0x1e4   : > { %1558 = vmatprep.mubr.msk.f32.mxu1 %vm543_vm0, %v747_v63 }
 0x1e5   : > { %1559 = vmatmul.mubr.msk.f32.gmra.mrb[10].mxu1 %vm543_vm0, %v748_v1 }
 0x1f1   : > { %v1523_v2 = vpop.f32.mrb[12].mxu0 }
 0x1f2   : > { %v724_v3 = vadd.f32 %v1523_v2, %v1367_v33  ;;  %v718_v0 = vpop.f32.mrb[13].mxu0 }
 0x1f3   : > { %v719_v5 = vadd.f32 %v1367_v33, %v718_v0 }
 0x1f4   : > { %v750_v6 = vmax.f32 %v724_v3, 0.0 }
 0x1f5   : > { %v749_v50 = vmax.f32 %v719_v5, 0.0 }
 0x1f7   : > { %1561 = vmatprep.mubr.msk.f32.mxu1 %vm543_vm0, %v749_v50 }
 0x1f8   : > { %1562 = vmatmul.mubr.msk.f32.gmra.mrb[12].mxu1 %vm543_vm0, %v750_v6 }
 0x204   : > { %v1526_v7 = vpop.f32.mrb[14].mxu0 }
 0x205   : > { %v734_v8 = vadd.f32 %v1526_v7, %v1367_v33  ;;  %v728_v9 = vpop.f32.mrb[15].mxu0 }
 0x206   : > { %v729_v10 = vadd.f32 %v1367_v33, %v728_v9 }
 0x207   : > { %v752_v12 = vmax.f32 %v734_v8, 0.0 }
 0x208   : > { %v751_v11 = vmax.f32 %v729_v10, 0.0 }
 0x20a   : > { %1564 = vmatprep.mubr.msk.f32.mxu1 %vm543_vm0, %v751_v11 }
 0x20b   : > { %1565 = vmatmul.mubr.msk.f32.gmra.mrb[14].mxu1 %vm543_vm0, %v752_v12 }
 0x20c   : > { %1602 = vmatprep.mubr.msk.f32.mxu1 %vm1833_vm1, %v1834_v25 }
 0x275   : > { %v1545_v33 = vpop.f32.mrb[0].mxu1 }
 0x276   : > { %v886_v35 = vadd.f32 %v1545_v33, %v2183_v4  ;;  %v880_v26 = vpop.f32.mrb[1].mxu1 }
 0x277   : > { %v881_v29 = vadd.f32 %v2183_v4, %v880_v26 }
 0x278   : > { %v960_v34 = vmax.f32 %v886_v35, 0.0 }
 0x279   : > { %v1548_v32 = vpop.f32.mrb[2].mxu1  ;;  %v959_v41 = vmax.f32 %v881_v29, 0.0 }
 0x27a   : > { %v896_v36 = vadd.f32 %v1548_v32, %v2183_v4  ;;  %v890_v37 = vpop.f32.mrb[3].mxu1  ;;  %v976_v57 = vsel %vm543_vm0, %v960_v34, -inf }
 0x27b   : > { %v891_v42 = vadd.f32 %v2183_v4, %v890_v37  ;;  %v975_v51 = vsel %vm543_vm0, %v959_v41, -inf }
 0x27c   : > { %v962_v43 = vmax.f32 %v896_v36, 0.0 }
 0x27d   : > { %v961_v45 = vmax.f32 %v891_v42, 0.0 }
 0x27e   : > { %v979_v47 = vsel %vm543_vm0, %v962_v43, -inf }
 0x27f   : > { %v980_v53 = vmax.f32 %v976_v57, %v979_v47  ;;  %v977_v54 = vsel %vm543_vm0, %v961_v45, -inf  ;;  %v1551_v55 = vpop.f32.mrb[4].mxu1 }
 0x280   : > { %v978_v56 = vmax.f32 %v975_v51, %v977_v54  ;;  %v906_v58 = vadd.f32 %v1551_v55, %v2183_v4  ;;  %v900_v59 = vpop.f32.mrb[5].mxu1 }
 0x281   : > { %v901_v60 = vadd.f32 %v2183_v4, %v900_v59 }
 0x282   : > { %v964_v62 = vmax.f32 %v906_v58, 0.0 }
 0x283   : > { %v963_v63 = vmax.f32 %v901_v60, 0.0 }
 0x284   : > { %v983_v1 = vsel %vm543_vm0, %v964_v62, -inf }
 0x285   : > { %v984_v2 = vmax.f32 %v980_v53, %v983_v1  ;;  %v981_v3 = vsel %vm543_vm0, %v963_v63, -inf }
 0x286   : > { %v982_v0 = vmax.f32 %v978_v56, %v981_v3 }
 0x292   : > { %v1554_v5 = vpop.f32.mrb[6].mxu1 }
 0x293   : > { %v916_v50 = vadd.f32 %v1554_v5, %v2183_v4  ;;  %v910_v6 = vpop.f32.mrb[7].mxu1 }
 0x294   : > { %v911_v7 = vadd.f32 %v2183_v4, %v910_v6  ;;  %v1195_v6 = vld [vmem:[%s2338_s1 + $0x148] sm:$0xff] }
 0x295   : > { %v966_v8 = vmax.f32 %v916_v50, 0.0  ;;  %v1194_v50 = vld [vmem:[%s2338_s1 + $0x140] sm:$0xff] }
 0x296   : > { %v965_v9 = vmax.f32 %v911_v7, 0.0  ;;  %v1196_v7 = vld [vmem:[%s2338_s1 + $0x150] sm:$0xff] }
 0x297   : > { %v987_v10 = vsel %vm543_vm0, %v966_v8, -inf  ;;  %v1681_v8 = vpack.c.bf16 %v1195_v6, %v1194_v50 }
 0x298   : > { %v988_v11 = vmax.f32 %v984_v2, %v987_v10  ;;  %v985_v12 = vsel %vm543_vm0, %v965_v9, -inf  ;;  %v1197_v9 = vld [vmem:[%s2338_s1 + $0x158] sm:$0xff] }
 0x299   : > { %v986_v13 = vmax.f32 %v982_v0, %v985_v12  ;;  %v1684_v10 = vpack.c.bf16 %v1197_v9, %v1196_v7 }
 0x29b   : > { %v989_v14 = vmax.f32 %v986_v13, %v988_v11  ;;  %v1199_v11 = vld [vmem:[%s2338_s1 + $0x168] sm:$0xff]  ;;  %v1401_v13 = vld [vmem:[%s2339_s2 + $0x3] ss:$0 sm:$0xff] }
 0x29d   : > { %v990_v45 = vrot.slane %v989_v14, 4 }
 0x29f   : > { %v991_v51 = vmax.f32 %v989_v14, %v990_v45 }
 0x2a1   : > { %v992_v58 = vrot.slane %v991_v51, 2 }
 0x2a3   : > { %v993_v61 = vmax.f32 %v991_v51, %v992_v58 }
 0x2a5   : > { %v1557_v16 = vpop.f32.mrb[8].mxu1  ;;  %v994_v1 = vrot.slane %v993_v61, 1 }
 0x2a6   : > { %v920_v17 = vpop.f32.mrb[9].mxu1  ;;  %v926_v18 = vadd.f32 %v1557_v16, %v2183_v4 }
 0x2a7   : > { %v921_v19 = vadd.f32 %v2183_v4, %v920_v17 }
 0x2a8   : > { %v968_v21 = vmax.f32 %v926_v18, 0.0 }
 0x2a9   : > { %v967_v52 = vmax.f32 %v921_v19, 0.0  ;;  %v1200_v19 = vld [vmem:[%s2338_s1 + $0x170] sm:$0xff] }
 0x2aa   : > { %v997_v26 = vsel %vm543_vm0, %v968_v21, -inf  ;;  %v1403_v21 = vld [vmem:[%s2339_s2 + $0x4] ss:$0 sm:$0xff] }
 0x2ab   : > { %v996_v28 = vsel %vm543_vm0, %v967_v52, -inf }
 0x2b8   : > { %v1560_v20 = vpop.f32.mrb[10].mxu1 }
 0x2b9   : > { %v936_v22 = vadd.f32 %v1560_v20, %v2183_v4  ;;  %v930_v23 = vpop.f32.mrb[11].mxu1 }
 0x2ba   : > { %v931_v24 = vadd.f32 %v2183_v4, %v930_v23 }
 0x2bb   : > { %v970_v33 = vmax.f32 %v936_v22, 0.0 }
 0x2bc   : > { %v969_v35 = vmax.f32 %v931_v24, 0.0 }
 0x2bd   : > { %v1000_v27 = vsel %vm543_vm0, %v970_v33, -inf  ;;  %v1405_v33 = vld [vmem:[%s2339_s2 + $0x5] ss:$0 sm:$0xff] }
 0x2be   : > { %v1001_v39 = vmax.f32 %v997_v26, %v1000_v27  ;;  %v998_v29 = vsel %vm543_vm0, %v969_v35, -inf }
 0x2bf   : > { %v999_v30 = vmax.f32 %v996_v28, %v998_v29 }
 0x2cb   : > { %v1563_v31 = vpop.f32.mrb[12].mxu1 }
 0x2cc   : > { %v946_v32 = vadd.f32 %v1563_v31, %v2183_v4  ;;  %v940_v44 = vpop.f32.mrb[13].mxu1 }
 0x2cd   : > { %v941_v34 = vadd.f32 %v2183_v4, %v940_v44 }
 0x2ce   : > { %v972_v36 = vmax.f32 %v946_v32, 0.0 }
 0x2cf   : > { %v971_v37 = vmax.f32 %v941_v34, 0.0 }
 0x2d0   : > { %v1004_v38 = vsel %vm543_vm0, %v972_v36, -inf }
 0x2d1   : > { %v1005_v40 = vmax.f32 %v1001_v39, %v1004_v38  ;;  %v1002_v41 = vsel %vm543_vm0, %v971_v37, -inf }
 0x2d2   : > { %v1003_v42 = vmax.f32 %v999_v30, %v1002_v41 }
 0x2de   : > { %v1566_v43 = vpop.f32.mrb[14].mxu1 }
 0x2df   : > { %v956_v46 = vadd.f32 %v1566_v43, %v2183_v4  ;;  %v950_v57 = vpop.f32.mrb[15].mxu1 }
 0x2e0   : > { %v951_v47 = vadd.f32 %v2183_v4, %v950_v57  ;;  %v995_v4 = vmax.f32 %v993_v61, %v994_v1 }
 0x2e1   : > { %v974_v48 = vmax.f32 %v956_v46, 0.0 }
 0x2e2   : > { %v973_v49 = vmax.f32 %v951_v47, 0.0 }
 0x2e3   : > { %v1008_v53 = vsel %vm543_vm0, %v974_v48, -inf }
 0x2e4   : > { %v1009_v54 = vmax.f32 %v1005_v40, %v1008_v53  ;;  %v1006_v55 = vsel %vm543_vm0, %v973_v49, -inf }
 0x2e5   : > { %v1007_v56 = vmax.f32 %v1003_v42, %v1006_v55 }
 0x2e7   : > { %v1010_v59 = vmax.f32 %v1007_v56, %v1009_v54 }
 0x2e9   : > { %v1011_v60 = vrot.slane %v1010_v59, 4 }
 0x2eb   : > { %v1012_v62 = vmax.f32 %v1010_v59, %v1011_v60 }
 0x2ed   : > { %v1013_v63 = vrot.slane %v1012_v62, 2 }
 0x2ef   : > { %v1014_v2 = vmax.f32 %v1012_v62, %v1013_v63 }
 0x2f1   : > { %v1015_v3 = vrot.slane %v1014_v2, 1 }
 0x2f3   : > { %v1016_v0 = vmax.f32 %v1014_v2, %v1015_v3 }
 0x2f5   : > { %v1033_v5 = vsel %vm1032_vm2, %v1016_v0, %v995_v4 }
 0x2f6   : > { %1584 = vmatmul.mubr.msk.f32.vlgmr.msra.gmra.mrb[16].mxu0 %vm543_vm0, %v1033_v5 }
 0x2f7   : > { %1621 = vmatprep.mubr.msk.f32.mxu0 %vm1833_vm1, %v1834_v25  ;;  %1682 = vmatpush3.bf16.msra.mxu0 %v1681_v8  ;;  %v1198_v25 = vld [vmem:[%s2338_s1 + $0x160] sm:$0xff] }
 0x2f8   : > { %1683 = vmatprep.subr.bf16.mxu0 %v1832_v15  ;;  %v1687_v12 = vpack.c.bf16 %v1199_v11, %v1198_v25 }
 0x2fb   : > { %1685 = vmatpush3.bf16.msra.mxu0 %v1684_v10 }
 0x2fc   : > { %1686 = vmatprep.subr.bf16.mxu0 %v1832_v15 }
 0x2ff   : > { %1688 = vmatpush3.bf16.msra.mxu0 %v1687_v12 }
 0x300   : > { %1689 = vmatprep.subr.bf16.mxu0 %v1832_v15  ;;  %v1201_v15 = vld [vmem:[%s2338_s1 + $0x178] sm:$0xff] }
 0x301   : > { %v1690_v20 = vpack.c.bf16 %v1201_v15, %v1200_v19 }
 0x303   : > { %1691 = vmatpush3.bf16.msra.mxu0 %v1690_v20 }
 0x3c9   : > { %v1102_v14 = vpop.f32.mrb[16].mxu0 }
 0x3ca   : > { %v1103_v16 = vadd.f32 %v1401_v13, %v1102_v14  ;;  %v1585_v17 = vpop.f32.mrb[17].mxu0 }
 0x3cc   : > { %v1106_v18 = vmax.f32 %v1103_v16, 0.0 }
 0x3ce   : > { %1603 = vmatmul.mubr.msk.f32.vlgmr.msra.gmra.mrb[16].mxu1 %vm543_vm0, %v1106_v18 }
 0x4a1   : > { %v1189_v22 = vpop.f32.mrb[16].mxu1 }
 0x4a2   : > { %v1190_v23 = vadd.f32 %v1403_v21, %v1189_v22  ;;  %v1604_v52 = vpop.f32.mrb[17].mxu1 }
 0x4a4   : > { %v1193_v24 = vmax.f32 %v1190_v23, 0.0 }
 0x4a6   : > { %1622 = vmatmul.mubr.msk.f32.vlgmr.msra.gmra.mrb[18].mxu0 %vm543_vm0, %v1193_v24 }
 0x579   : > { %v1276_v35 = vpop.f32.mrb[18].mxu0 }
 0x57a   : > { %v1277_v26 = vadd.f32 %v1405_v33, %v1276_v35  ;;  %v1623_v27 = vpop.f32.mrb[19].mxu0 }
 0x57c   : > { %1281 = vst.msk [vmem:[%s166_s19] sm:$0x3] %vm1280_vm3, %v1277_v26 }
 0x57d   : > { %1778 = shalt.err (!%p1775_p3)
}
 0x57e   : > { %s1779_s28 = scalar_lea.hbm %s2295_s26, 32  ;;  %s1783_s7 = scalar_lea.hbm %s2340_s3, 64 }
 0x57f   : > { %p1780_p4 = scmp.ne.s32.totalorder %s2295_s26, %s1779_s28  ;;  %p1784_p9 = scmp.lt.u32.totalorder %s2295_s26, %s2340_s3 }
 0x580   : > { %p1785_p10 = scmp.lt.u32.totalorder %s1783_s7, %s1779_s28  ;;  %p1787_p12 = scmp.lt.u32.totalorder %s1779_s28, %s2295_s26 }
 0x581   : > { %p1781_p7 = pnand %p1780_p4, %p1894_p5 }
 0x582   : > { %p1786_p11 = por %p1785_p10, %p1784_p9 }
 0x583   : > { %p1782_p8 = pneg %p1781_p7 }
 0x584   : > { %p1788_p13 = por %p1787_p12, %p1786_p11 }
 0x586   : > { %p1789_p0 = pnand %p1788_p13, %p1782_p8 }
 0x588   : > { %1792 = shalt.err (!%p1789_p0)
}
 0x589   : > { %1692 = dma.vmem_to_hbm [thread:$0]  (%p1894_p5), %s2297_s20, 32, %s2295_s26, %s1283_s27  }
 0x58a PF: > { %p1698_p1 = scmp.ge.s32.totalorder %s1827_s15, 2  ;;  %s1308_s10 = sand.u32 1, %s1815_s12  }
 0x58b   : > { %s1309_s11 = scalar_lea.sflag [#allocation3], %s1308_s10 }
 0x58c   : > { %p1695_p2 = pnand %p1698_p1, %p1898_p6 }
 0x58e   : > { %1810 = dma.done.wait (!%p1695_p2), %s1309_s11, 32  }
 0x58f   : > { %1812 = vsyncadd (!%p1695_p2), %s1309_s11, 4294967264  ;;  %p13_p3 = scmp.ge.s32.totalorder %s1881_s18, 4   ;;  %s2343_s12 = smov %s1819_s13 }
 0x590   : > { %s2344_s13 = smov %s1823_s14  ;;  %s2345_s14 = smov %s1892_s21 }
 0x591   : > { %s2346_s15 = smov %s1881_s18  ;;  %15 = sbr.rel (!%p13_p3) target bundleno = 3 (0x3), region = 67 }
 0x598   :  { %1314 = vsyncpa [#allocation3], 1 }
 0x599   :  { %1316 = vsyncpa [#allocation3 + $0x1], 1 }

</bundles_post_ra>
